<compile_context>
chip_gen: v7x
topology: tpu7x:2x2x1
jax: 0.10.0
libtpu: 0.0.40
codegen_flags: <defaults>
</compile_context>

<pallas_src>
import functools

import jax
import jax.numpy as jnp
from jax.experimental import pallas as pl
from jax.experimental.pallas import tpu as pltpu


def _round_up(x, m):
    return (x + m - 1) // m * m


def _vmem_budget_bytes():
    # Physical VMEM per core, with headroom for compiler internal scratch.
    try:
        cap = int(pltpu.get_tpu_info().vmem_capacity_bytes)
    except Exception:
        cap = 64 * 1024 * 1024  # conservative (v7x-sized) fallback
    return int(cap * 0.85)


def _proj_logsoftmax_kernel(x_ref, w_ref, b_ref, o_ref, m_sc, l_sc, *, tn):
    # x_ref:  (tm, d_model)   bf16 input rows tile
    # w_ref:  (d_model, tn)   bf16 weight column tile (torch weight.T layout)
    # b_ref:  (1, tn)         f32 bias tile (padded lanes carry -1e30)
    # o_ref:  (tm, vocab_p)   output log-probs, VMEM-resident across the vocab axis
    # m_sc, l_sc: (tm, 1)     running max / running sum (online LSE)
    j = pl.program_id(1)
    nj = pl.num_programs(1)

    @pl.when(j == 0)
    def _():
        m_sc[...] = jnp.full_like(m_sc, -jnp.inf)
        l_sc[...] = jnp.zeros_like(l_sc)

    # MXU matmul (bf16 x bf16 -> f32 accumulation), bias add in f32.
    logits = jnp.dot(x_ref[...], w_ref[...],
                     preferred_element_type=jnp.float32)
    logits = logits + b_ref[...]

    # Write raw logits straight into the resident output block (lane-dense store).
    o_ref[:, pl.ds(pl.multiple_of(j * tn, tn), tn)] = logits.astype(o_ref.dtype)

    # Online log-sum-exp across vocab tiles.
    m_old = m_sc[...]
    m_new = jnp.maximum(m_old, jnp.max(logits, axis=-1, keepdims=True))
    l_sc[...] = (l_sc[...] * jnp.exp(m_old - m_new)
                 + jnp.sum(jnp.exp(logits - m_new), axis=-1, keepdims=True))
    m_sc[...] = m_new

    @pl.when(j == nj - 1)
    def _():
        lse = m_sc[...] + jnp.log(l_sc[...])
        o_ref[...] = (o_ref[...] - lse).astype(o_ref.dtype)


def projection_layer(x, weight_t, bias, *, tm=256, tn=1024,
                     out_dtype=jnp.float32):
    """log_softmax(x @ weight_t + bias, axis=-1).

    x:        (B, S, d_model)
    weight_t: (d_model, vocab)   (i.e. PyTorch nn.Linear weight.T)
    bias:     (vocab,)
    """
    B, S, d_model = x.shape
    vocab = weight_t.shape[1]
    M = B * S
    out_itemsize = jnp.dtype(out_dtype).itemsize

    # ---- tile plan (auto-fit to problem size and VMEM budget) ---------------
    budget = _vmem_budget_bytes()

    def est_bytes(tm_, tn_, vp_):
        return (2 * tm_ * d_model * 2          # bf16 x tile (double-buffered)
                + 2 * d_model * tn_ * 2        # bf16 weight tile
                + 2 * tn_ * 4                  # f32 bias tile
                + 2 * tm_ * vp_ * out_itemsize  # vocab-resident output block
                + 4 * tm_ * 4)                  # m/l scratch

    tm_eff = _round_up(min(tm, _round_up(M, 8)), 8)
    tn_eff = min(_round_up(tn, 128), _round_up(vocab, 128))
    vocab_p = _round_up(vocab, tn_eff)

    while est_bytes(tm_eff, tn_eff, vocab_p) > budget and tm_eff > 8:
        tm_eff = max(8, _round_up(tm_eff // 2, 8))
    while est_bytes(tm_eff, tn_eff, vocab_p) > budget and tn_eff > 128:
        tn_eff = max(128, _round_up(tn_eff // 2, 128))
        vocab_p = _round_up(vocab, tn_eff)
    # TODO(synk): for vocab so large that even tm=8 doesn't fit (huge vocab on v7x's
    # 64 MiB VMEM), switch to per-tile output + separate LSE output and subtract
    # the LSE in the consumer instead of keeping a vocab-wide resident output block.

    Mp = _round_up(M, tm_eff)
    grid = (Mp // tm_eff, vocab_p // tn_eff)

    # ---- cast / pad inputs to the tile grid ---------------------------------
    x2d = x.reshape(M, d_model).astype(jnp.bfloat16)
    if Mp != M:
        x2d = jnp.pad(x2d, ((0, Mp - M), (0, 0)))
    w = weight_t.astype(jnp.bfloat16)
    b = bias.astype(jnp.float32)
    if vocab_p != vocab:
        w = jnp.pad(w, ((0, 0), (0, vocab_p - vocab)))
        # Padded vocab lanes get a hugely negative bias -> contribute ~0 to the
        # softmax sum with no per-tile masking; they are sliced off in the wrapper.
        b = jnp.pad(b, ((0, vocab_p - vocab),), constant_values=-1e30)
    b2d = b.reshape(1, vocab_p)

    est = est_bytes(tm_eff, tn_eff, vocab_p)
    vmem_limit = int(min(max(2 * est, 32 * 1024 * 1024), budget))

    cost = pl.CostEstimate(
        flops=2 * Mp * d_model * vocab_p,
        transcendentals=Mp * vocab_p,
        bytes_accessed=(Mp * d_model * 2                       # x (bf16)
                        + grid[0] * d_model * vocab_p * 2      # weight re-stream
                        + vocab_p * 4                          # bias
                        + Mp * vocab_p * out_itemsize))        # output

    kernel = functools.partial(_proj_logsoftmax_kernel, tn=tn_eff)

    out2d = pl.pallas_call(
        kernel,
        out_shape=jax.ShapeDtypeStruct((Mp, vocab_p), out_dtype),
        grid_spec=pltpu.PrefetchScalarGridSpec(
            num_scalar_prefetch=0,
            grid=grid,
            in_specs=[
                pl.BlockSpec((tm_eff, d_model), lambda i, j: (i, 0)),
                pl.BlockSpec((d_model, tn_eff), lambda i, j: (0, j)),
                pl.BlockSpec((1, tn_eff), lambda i, j: (0, j)),
            ],
            out_specs=pl.BlockSpec((tm_eff, vocab_p), lambda i, j: (i, 0)),
            scratch_shapes=[
                pltpu.VMEM((tm_eff, 1), jnp.float32),   # running max
                pltpu.VMEM((tm_eff, 1), jnp.float32),   # running sum
            ]),
        compiler_params=pltpu.CompilerParams(
            dimension_semantics=("parallel", "arbitrary"),
            vmem_limit_bytes=vmem_limit),
        cost_estimate=cost,
    )(x2d, w, b2d)

    return out2d[:M, :vocab].reshape(B, S, vocab)


if __name__ == "__main__":
    # Small shapes consistent with the module; vocab deliberately NOT a multiple of 128
    # so the padded-lane handling + multi-tile online LSE path is exercised.
    B, S, d_model, vocab = 2, 8, 32, 200

    key = jax.random.PRNGKey(0)
    kx, kw, kb = jax.random.split(key, 3)

    # deterministic init mimicking nn.Linear default: U(-1/sqrt(d_model), 1/sqrt(d_model))
    bound = 1.0 / (d_model ** 0.5)
    weight = jax.random.uniform(kw, (vocab, d_model), jnp.float32, -bound, bound)  # torch layout
    bias = jax.random.uniform(kb, (vocab,), jnp.float32, -bound, bound)
    x = jax.random.normal(kx, (B, S, d_model), jnp.float32)

    out = projection_layer(x, weight.T, bias, tm=128, tn=128)  # tn=128 -> 2 vocab tiles
    out = jax.block_until_ready(out)

    # reference in plain JAX with the same bf16 operand / f32 accumulation contract
    logits_ref = jnp.dot(x.reshape(-1, d_model).astype(jnp.bfloat16),
                         weight.T.astype(jnp.bfloat16),
                         preferred_element_type=jnp.float32).reshape(B, S, vocab) + bias
    ref = jax.nn.log_softmax(logits_ref, axis=-1)

    assert out.shape == (B, S, vocab)
    assert bool(jnp.isfinite(out).all()), "non-finite values in output"
    assert jnp.allclose(out, ref, atol=2e-3, rtol=2e-3), "mismatch vs reference"

    print("KERNEL_OK")
</pallas_src>

<mosaic_0001>
module attributes {stable_mosaic.version = 11 : i64} {
  func.func @_proj_logsoftmax_kernel(%arg0: i32, %arg1: i32, %arg2: memref<16x32xbf16, #tpu.memory_space<vmem>>, %arg3: memref<32x128xbf16, #tpu.memory_space<vmem>>, %arg4: memref<1x128xf32, #tpu.memory_space<vmem>>, %arg5: memref<16x256xf32, #tpu.memory_space<vmem>>, %arg6: memref<16x1xf32, #tpu.memory_space<vmem>>, %arg7: memref<16x1xf32, #tpu.memory_space<vmem>>) attributes {dimension_semantics = [#tpu.dimension_semantics<parallel>, #tpu.dimension_semantics<arbitrary>], iteration_bounds = array<i64: 1, 2>, scalar_prefetch = 0 : i64, scratch_operands = 2 : i64, tpu.core_type = #tpu.core_type<tc>, window_params = [{transform_indices = @transform_0, window_bounds = array<i64: 16, 32>}, {transform_indices = @transform_1, window_bounds = array<i64: 32, 128>}, {transform_indices = @transform_2, window_bounds = array<i64: 1, 128>}, {transform_indices = @transform_3, window_bounds = array<i64: 16, 256>}]} {
    %c0_i32 = arith.constant 0 : i32
    %0 = arith.cmpi eq, %arg1, %c0_i32 : i32
    %1 = arith.extui %0 : i1 to i32
    %c0_i32_0 = arith.constant 0 : i32
    %2 = arith.cmpi ne, %1, %c0_i32_0 : i32
    scf.if %2 {
      %cst_18 = arith.constant 0xFF800000 : f32
      %32 = vector.broadcast %cst_18 : f32 to vector<16x1xf32>
      %c0_19 = arith.constant 0 : index
      %c0_20 = arith.constant 0 : index
      %33 = vector.load %arg6[%c0_19, %c0_20] : memref<16x1xf32, #tpu.memory_space<vmem>>, vector<16x1xf32>
      tpu.vector_store %arg6[%c0_19, %c0_20], %32 {strides = array<i32>} : memref<16x1xf32, #tpu.memory_space<vmem>>, vector<16x1xf32>,
      %cst_21 = arith.constant 0.000000e+00 : f32
      %34 = vector.broadcast %cst_21 : f32 to vector<16x1xf32>
      %c0_22 = arith.constant 0 : index
      %c0_23 = arith.constant 0 : index
      %35 = vector.load %arg7[%c0_22, %c0_23] : memref<16x1xf32, #tpu.memory_space<vmem>>, vector<16x1xf32>
      tpu.vector_store %arg7[%c0_22, %c0_23], %34 {strides = array<i32>} : memref<16x1xf32, #tpu.memory_space<vmem>>, vector<16x1xf32>,
    } else {
    }
    %c0 = arith.constant 0 : index
    %c0_1 = arith.constant 0 : index
    %3 = vector.load %arg2[%c0, %c0_1] : memref<16x32xbf16, #tpu.memory_space<vmem>>, vector<16x32xbf16>
    %c0_2 = arith.constant 0 : index
    %c0_3 = arith.constant 0 : index
    %4 = vector.load %arg3[%c0_2, %c0_3] : memref<32x128xbf16, #tpu.memory_space<vmem>>, vector<32x128xbf16>
    %cst = arith.constant dense<0.000000e+00> : vector<16x128xf32>
    %5 = tpu.matmul %3, %4, %cst {dimension_numbers = #tpu.dot_dimension_numbers<[1], [0], [0], [1], [0, 0, 1, 1], [], []>} : vector<16x32xbf16>, vector<32x128xbf16>, vector<16x128xf32> -> vector<16x128xf32>
    %c0_4 = arith.constant 0 : index
    %c0_5 = arith.constant 0 : index
    %6 = vector.load %arg4[%c0_4, %c0_5] : memref<1x128xf32, #tpu.memory_space<vmem>>, vector<1x128xf32>
    %7 = vector.broadcast %6 : vector<1x128xf32> to vector<16x128xf32>
    %8 = arith.addf %5, %7 : vector<16x128xf32>
    %c128_i32 = arith.constant 128 : i32
    %9 = arith.muli %arg1, %c128_i32 : i32
    %10 = tpu.assume_multiple %9, 128 : i32
    %c0_6 = arith.constant 0 : index
    %11 = arith.index_cast %10 : i32 to index
    %12 = vector.load %arg5[%c0_6, %11] : memref<16x256xf32, #tpu.memory_space<vmem>>, vector<16x128xf32>
    tpu.vector_store %arg5[%c0_6, %11], %8 {strides = array<i32>} : memref<16x256xf32, #tpu.memory_space<vmem>>, vector<16x128xf32>,
    %c0_7 = arith.constant 0 : index
    %c0_8 = arith.constant 0 : index
    %13 = vector.load %arg6[%c0_7, %c0_8] : memref<16x1xf32, #tpu.memory_space<vmem>>, vector<16x1xf32>
    %cst_9 = arith.constant dense<0xFF800000> : vector<16xf32>
    %14 = vector.multi_reduction <maximumf>, %8, %cst_9 [1] : vector<16x128xf32> to vector<16xf32>
    %15 = vector.shape_cast %14 : vector<16xf32> to vector<16x1xf32>
    %16 = arith.maximumf %13, %15 : vector<16x1xf32>
    %c0_10 = arith.constant 0 : index
    %c0_11 = arith.constant 0 : index
    %17 = vector.load %arg7[%c0_10, %c0_11] : memref<16x1xf32, #tpu.memory_space<vmem>>, vector<16x1xf32>
    %18 = arith.subf %13, %16 : vector<16x1xf32>
    %19 = math.exp %18 : vector<16x1xf32>
    %20 = arith.mulf %17, %19 : vector<16x1xf32>
    %21 = vector.broadcast %16 : vector<16x1xf32> to vector<16x128xf32>
    %22 = arith.subf %8, %21 : vector<16x128xf32>
    %23 = math.exp %22 : vector<16x128xf32>
    %cst_12 = arith.constant dense<0.000000e+00> : vector<16xf32>
    %24 = vector.multi_reduction <add>, %23, %cst_12 [1] : vector<16x128xf32> to vector<16xf32>
    %25 = vector.shape_cast %24 : vector<16xf32> to vector<16x1xf32>
    %26 = arith.addf %20, %25 : vector<16x1xf32>
    %c0_13 = arith.constant 0 : index
    %c0_14 = arith.constant 0 : index
    %27 = vector.load %arg7[%c0_13, %c0_14] : memref<16x1xf32, #tpu.memory_space<vmem>>, vector<16x1xf32>
    tpu.vector_store %arg7[%c0_13, %c0_14], %26 {strides = array<i32>} : memref<16x1xf32, #tpu.memory_space<vmem>>, vector<16x1xf32>,
    %c0_15 = arith.constant 0 : index
    %c0_16 = arith.constant 0 : index
    %28 = vector.load %arg6[%c0_15, %c0_16] : memref<16x1xf32, #tpu.memory_space<vmem>>, vector<16x1xf32>
    tpu.vector_store %arg6[%c0_15, %c0_16], %16 {strides = array<i32>} : memref<16x1xf32, #tpu.memory_space<vmem>>, vector<16x1xf32>,
    %c1_i32 = arith.constant 1 : i32
    %29 = arith.cmpi eq, %arg1, %c1_i32 : i32
    %30 = arith.extui %29 : i1 to i32
    %c0_i32_17 = arith.constant 0 : i32
    %31 = arith.cmpi ne, %30, %c0_i32_17 : i32
    scf.if %31 {
      %c0_18 = arith.constant 0 : index
      %c0_19 = arith.constant 0 : index
      %32 = vector.load %arg6[%c0_18, %c0_19] : memref<16x1xf32, #tpu.memory_space<vmem>>, vector<16x1xf32>
      %c0_20 = arith.constant 0 : index
      %c0_21 = arith.constant 0 : index
      %33 = vector.load %arg7[%c0_20, %c0_21] : memref<16x1xf32, #tpu.memory_space<vmem>>, vector<16x1xf32>
      %34 = math.log %33 : vector<16x1xf32>
      %35 = arith.addf %32, %34 : vector<16x1xf32>
      %c0_22 = arith.constant 0 : index
      %c0_23 = arith.constant 0 : index
      %36 = vector.load %arg5[%c0_22, %c0_23] : memref<16x256xf32, #tpu.memory_space<vmem>>, vector<16x256xf32>
      %37 = vector.broadcast %35 : vector<16x1xf32> to vector<16x256xf32>
      %38 = arith.subf %36, %37 : vector<16x256xf32>
      %c0_24 = arith.constant 0 : index
      %c0_25 = arith.constant 0 : index
      %39 = vector.load %arg5[%c0_24, %c0_25] : memref<16x256xf32, #tpu.memory_space<vmem>>, vector<16x256xf32>
      tpu.vector_store %arg5[%c0_24, %c0_25], %38 {strides = array<i32>} : memref<16x256xf32, #tpu.memory_space<vmem>>, vector<16x256xf32>,
    } else {
    }
    return
  }
  func.func @transform_0(%arg0: i32, %arg1: i32) -> (i32, i32) {
    %c0_i32 = arith.constant 0 : i32
    %c0_i32_0 = arith.constant 0 : i32
    return %arg0, %c0_i32 : i32, i32
  }
  func.func @transform_1(%arg0: i32, %arg1: i32) -> (i32, i32) {
    %c0_i32 = arith.constant 0 : i32
    %c0_i32_0 = arith.constant 0 : i32
    return %c0_i32, %arg1 : i32, i32
  }
  func.func @transform_2(%arg0: i32, %arg1: i32) -> (i32, i32) {
    %c0_i32 = arith.constant 0 : i32
    %c0_i32_0 = arith.constant 0 : i32
    return %c0_i32, %arg1 : i32, i32
  }
  func.func @transform_3(%arg0: i32, %arg1: i32) -> (i32, i32) {
    %c0_i32 = arith.constant 0 : i32
    %c0_i32_0 = arith.constant 0 : i32
    return %arg0, %c0_i32 : i32, i32
  }
}

</mosaic_0001>

<bundles_post_ra>
// kernel: tpu_custom_call.1
= control target key start
LH: loop header
LB: loop body
LE: loop exit
PB: predicated region body
PF: predicated region fallthrough
CT: control target
= control target key end

     0   :  { %8 = vsyncpa [#allocation5], 0  ;;  %s1019_s0 = inlined_call_operand.hbm [shape: bf16[16,32], index: 0, kind: input, shape index: {}]   ;;  %s1020_s1 = inlined_call_operand.hbm [shape: bf16[32,256], index: 1, kind: input, shape index: {}]   ;;  %s1021_s2 = inlined_call_operand.vmem [shape: f32[1,256], index: 2, kind: input, shape index: {}]   ;;  %s1022_s3 = inlined_call_operand.hbm [shape: f32[16,256], index: 3, kind: output, shape index: {}]  }
   0x1   :  { %9 = vsyncpa [#allocation8], 0 }
   0x2   :  { %11 = vsyncpa [#allocation8 + $0x1], 0 }
   0x3   :  { %12 = vsyncpa [#allocation6], 0  ;;  %s817_s12 = smov 0   ;;  %s819_s13 = smov 0  }
   0x4   :  { %s821_s14 = smov 0   ;;  %s823_s15 = smov 0  }
   0x5   :  { %s825_s16 = smov 0   ;;  %s827_s17 = smov 0  }
   0x6 LB: > { %s504_s18 = sadd.s32 4294967295, %s781_s17   ;;  %p70_p0 = scmp.ne.s32.totalorder %s769_s14, %s765_s13  ;;  %s781_s17 = sphi %s827_s17, %s18_s17   ;;  %s777_s16 = sphi %s825_s16, %s1043_s16   ;;  %s773_s15 = sphi %s823_s15, %s1042_s15   ;;  %s769_s14 = sphi %s821_s14, %s1041_s14   ;;  %s765_s13 = sphi %s819_s13, %s1040_s13   ;;  %s761_s12 = sphi %s817_s12, %s1039_s12  }
   0x7   : > { %p71_p1 = scmp.eq.s32.totalorder %s781_s17, 0  ;;  %p76_p2 = scmp.ne.s32.totalorder %s765_s13, %s761_s12 }
   0x8   : > { %p852_p3 = scmp.eq.s32.totalorder %s504_s18, 0  ;;  %p505_p4 = scmp.ge.s32.totalorder %s781_s17, 1 }
   0x9   : > { %p72_p5 = por %p71_p1, %p70_p0  ;;  %p139_p6 = scmp.lt.s32.totalorder %s781_s17, 3 }
   0xa   : > { %s1028_s19 = scalar_select %p852_p3, 1, 0 }
   0xb   : > { %p860_p7 = por %p852_p3, %p76_p2  ;;  %p864_p8 = pnand %p505_p4, %p139_p6 }
   0xc   : > { %s783_s22 = smov [#allocation4]   ;;  %p556_p11 = scmp.lt.s32.totalorder %s781_s17, 2 }
   0xd   : > { %s1029_s20 = scalar_select %p860_p7, 1, 0 }
   0xe   : > { %s1030_s21 = scalar_select %p864_p8, 1, 0 }
   0xf   : > { %s154_s23 = sshll.u32 %s783_s22, 4  ;;  %p547_p9 = pneg %p864_p8  ;;  %s155_s23 = int_to_ptr.vmem [resolvable:$true] %s154_s23 }
  0x10   : > { %s63_s25 = sadd.s32 1, %s769_s14  ;;  %p878_p12 = pnand %p556_p11, %p72_p5 }
  0x11   : > { %p872_p10 = pnand %p547_p9, %p852_p3  ;;  %s639_s29 = scalar_lea.hbm %s1019_s0, 128 }
  0x12   : > { %s1032_s26 = scalar_select %p878_p12, 1, 0 }
  0x13   : > { %p640_p13 = scmp.ne.s32.totalorder %s1019_s0, %s639_s29  ;;  %p641_p0 = pneg %p872_p10 }
  0x14   : > { %p646_p4 = scmp.lt.u32.totalorder %s639_s29, %s1019_s0 }
  0x15   : > { %p642_p1 = pnand %p641_p0, %p640_p13 }
  0x17   : > { %p643_p2 = pneg %p642_p1 }
  0x19   : > { %p648_p5 = pnand %p646_p4, %p643_p2 }
  0x1b   : > { %651 = shalt.err (!%p648_p5)
}
  0x1c   : > { %s652_s7 = scalar_lea.vmem %s155_s23, 128  ;;  %p660_p7 = scmp.lt.s32.totalorder %s155_s23, %s155_s23 }
  0x1d   : > { %p653_p6 = scmp.ne.s32.totalorder %s155_s23, %s652_s7  ;;  %p661_p3 = scmp.lt.s32.totalorder %s652_s7, %s652_s7 }
  0x1f   : > { %p655_p9 = pnand %p653_p6, %p641_p0  ;;  %p662_p8 = por %p661_p3, %p660_p7 }
  0x21   : > { %p656_p11 = pneg %p655_p9 }
  0x23   : > { %p663_p12 = pnand %p662_p8, %p656_p11 }
  0x25   : > { %666 = shalt.err (!%p663_p12)
}
  0x26   : > { %s784_s8 = smov 64   ;;  %s785_s9 = smov 4  }
  0x27   : > { %550 = dma.hbm_to_vmem [thread:$0]  (!%p872_p10), %s1019_s0, 128, %s155_s23, [#allocation5], %s784_s8, %s784_s8, %s785_s9  }
  0x28   : > { %s27_s12 = sadd.s32 1, %s777_s16  ;;  %s168_s22 = sand.u32 1, %s769_s14  }
  0x29   : > { %p28_p3 = scmp.ge.s32.totalorder %s27_s12, 2  ;;  %s508_s27 = sshll.u32 %s168_s22, 4 }
  0x2a   : > { %s509_s28 = sshll.u32 %s777_s16, 6  ;;  %s172_s23 = scalar_lea.vmem [#allocation7], %s508_s27 }
  0x2b   : > { %s1045_s12 = smov (%p28_p3, %s27_s12), 0  ;;  %s909_s24 = scalar_lea.hbm %s1020_s1, %s509_s28 }
  0x2c   : > { %s60_s4 = ssub.s32 %s777_s16, %s1045_s12  ;;  %s178_s5 = sshll.u32 %s172_s23, 4  ;;  %s913_s5 = int_to_ptr.vmem [resolvable:$true] %s178_s5 }
  0x2d   : > { %p61_p7 = scmp.eq.s32.totalorder %s60_s4, 0  ;;  %s920_s7 = scalar_lea.sflag [#allocation8], %s168_s22 }
  0x2e   : > { %s667_s10 = scalar_lea.hbm %s909_s24, 256  ;;  %p1033_p10 = scmp.ne.s32.totalorder %s1032_s26, 0 }
  0x2f   : > { %s918_s6 = scalar_select %p61_p7, %s769_s14, %s63_s25  }
  0x30   : > { %p668_p8 = scmp.ne.s32.totalorder %s909_s24, %s667_s10  ;;  %p669_p12 = pneg %p1033_p10 }
  0x31   : > { %s672_s27 = scalar_lea.hbm %s1020_s1, 512  ;;  %p673_p1 = scmp.lt.u32.totalorder %s909_s24, %s1020_s1 }
  0x32   : > { %p670_p13 = pnand %p669_p12, %p668_p8  ;;  %p674_p2 = scmp.lt.u32.totalorder %s672_s27, %s667_s10 }
  0x33   : > { %p676_p5 = scmp.lt.u32.totalorder %s667_s10, %s909_s24 }
  0x34   : > { %p671_p0 = pneg %p670_p13  ;;  %p675_p4 = por %p674_p2, %p673_p1 }
  0x36   : > { %p677_p6 = por %p676_p5, %p675_p4 }
  0x38   : > { %p678_p9 = pnand %p677_p6, %p671_p0 }
  0x3a   : > { %681 = shalt.err (!%p678_p9)
}
  0x3b   : > { %s682_s25 = scalar_lea.vmem %s913_s5, 256  ;;  %s786_s22 = smov [#allocation7]  }
  0x3c   : > { %p683_p11 = scmp.ne.s32.totalorder %s913_s5, %s682_s25  ;;  %s687_s4 = sshll.u32 %s786_s22, 4  ;;  %s688_s4 = int_to_ptr.vmem [resolvable:$false] %s687_s4 }
  0x3d   : > { %s689_s23 = scalar_lea.vmem %s688_s4, 512  ;;  %p690_p8 = scmp.lt.s32.totalorder %s913_s5, %s688_s4 }
  0x3e   : > { %p685_p3 = pnand %p683_p11, %p669_p12  ;;  %p691_p13 = scmp.lt.s32.totalorder %s689_s23, %s682_s25 }
  0x40   : > { %p686_p7 = pneg %p685_p3  ;;  %p692_p1 = por %p691_p13, %p690_p8 }
  0x42   : > { %p693_p2 = pnand %p692_p1, %p686_p7 }
  0x44   : > { %696 = shalt.err (!%p693_p2)
}
  0x45   : > { %s787_s10 = smov 128   ;;  %p1034_p12 = scmp.ne.s32.totalorder %s1030_s21, 0 }
  0x46   : > { %554 = dma.hbm_to_vmem [thread:$0]  (!%p1033_p10), %s909_s24, 256, %s913_s5, %s920_s7, %s787_s10, %s784_s8, %s785_s9  }
  0x47   : > { %196 = sbr.rel (%p1034_p12) target bundleno = 931 (0x3a3), region = 32  ;;  %p1035_p0 = scmp.ne.s32.totalorder (!%p1034_p12), %s1028_s19, 0 }
  0x4e   : > { %748 = dma.done.wait (%p1035_p0), [#allocation5], 128  }
  0x4f   : > { %750 = vsyncadd (%p1035_p0), [#allocation5], 4294967168  ;;  %s202_s11 = sand.u32 1, %s765_s13   ;;  %p1036_p4 = scmp.ne.s32.totalorder %s1029_s20, 0 }
  0x50   : > { %s512_s28 = sshll.u32 %s202_s11, 4  ;;  %s203_s26 = scalar_lea.sflag [#allocation8], %s202_s11 }
  0x51   : > { %s206_s27 = scalar_lea.vmem [#allocation7], %s512_s28 }
  0x52   : > { %752 = dma.done.wait (%p1036_p4), %s203_s26, 256  }
  0x53   : > { %754 = vsyncadd (%p1036_p4), %s203_s26, 4294967040  ;;  %p228_p10 = scmp.lt.s32.totalorder %s773_s15, 1  ;;  %p513_p5 = scmp.ne.s32.totalorder %s773_s15, 0 }
  0x54   : > { %vm237_vm0 = vcmask (!%p513_p5), 7168   ;;  %v788_v0 = vmov (!%p513_p5), -inf   ;;  %v789_v1 = vmov (!%p513_p5), 0.0  }
  0x55   : > { %s229_s21 = scalar_select %p228_p10, %s773_s15, 1 }
  0x56   : > { %236 = sbr.rel (%p513_p5) target bundleno = 93 (0x5d), region = 44  ;;  %238 = vst.msk [vmem:[#allocation2] sm:$0xff] (!%p513_p5), %vm237_vm0, %v788_v0  ;;  %239 = vst.msk [vmem:[#allocation2 + $0x8] sm:$0xff] (!%p513_p5), %vm237_vm0, %v788_v0 }
  0x57   : > { %s230_s19 = scalar_lea.vmem %s1021_s2, %s229_s21  ;;  %240 = vst.msk [vmem:[#allocation3] sm:$0xff] (!%p513_p5), %vm237_vm0, %v789_v1  ;;  %241 = vst.msk [vmem:[#allocation3 + $0x8] sm:$0xff] (!%p513_p5), %vm237_vm0, %v789_v1 }
  0x5d PF: > { %v623_v2 = vld [vmem:[%s206_s27] sm:$0xff]   ;;  %v790_v3 = vmov 0.0   ;;  %v624_v4 = vld [vmem:[%s206_s27 + $0x8] sm:$0xff]   ;;  %vm791_vm1 = vmmov 0   ;;  %vm272_vm2 = vcmask 261120   ;;  %s519_s20 = sshll.u32 %s773_s15, 7 }
  0x5e   : > { %529 = vmatprep.subr.bf16.mxu0 %v790_v3  ;;  %533 = vmatprep.mubr.msk.bf16.mxu0 %vm791_vm1, %v790_v3  ;;  %v625_v5 = vld [vmem:[#allocation4] sm:$0xff]   ;;  %s318_s24 = sshra.s32 %s519_s20, 7  ;;  %v792_v13 = vmov 0   ;;  %vm364_vm3 = vcmask 7168   ;;  %v325_v17 = vld [vmem:[#allocation2 + $0x8] sm:$0xff]  ;;  %v332_v33 = vld [vmem:[#allocation3] sm:$0xff] }
  0x5f   : > { %530 = vmatpush3.bf16.msra.mxu0 %v623_v2  ;;  %s520_s5 = sshll.u32 %s318_s24, 3  ;;  %v514_v6 = vld [vmem:[%s230_s19] ss:$0 sm:$0xff]  ;;  %621 = vset.pattern.permute.xlu1 %v792_v13  ;;  %v333_v37 = vld [vmem:[#allocation3 + $0x8] sm:$0xff]  ;;  %p521_p6 = scmp.ne.s32.totalorder %s773_s15, 1 }
  0x60   : > { %531 = vmatprep.subr.bf16.mxu0 %v790_v3  ;;  %s321_s7 = scalar_lea.vmem [#allocation9], %s520_s5  ;;  %622 = vset.pattern.permute.xlu0 %v792_v13  ;;  %v324_v14 = vld [vmem:[#allocation2] sm:$0xff]  ;;  %v793_v43 = vmov (!%p521_p6), 0  }
  0x61   : > { %634 = vset.pattern.permute.xlu0 (!%p521_p6), %v793_v43 }
  0x63   : > { %532 = vmatpush3.bf16.msra.mxu0 %v624_v4 }
  0x66   : > { %534 = vmatmul.mubr.msk.bf16.vlgmr.msra.gmra.mrb[0].mxu0 %vm272_vm2, %v625_v5 }
 0x139   : > { %v310_v7 = vpop.f32.mrb[0].mxu0 }
 0x13a   : > { %v311_v8 = vadd.f32 %v514_v6, %v310_v7  ;;  %v535_v9 = vpop.f32.mrb[1].mxu0 }
 0x13b   : > { %v313_v10 = vpop.f32.mrb[2].mxu0 }
 0x13c   : > { %322 = vst [vmem:[%s321_s7] sm:$0xff] %v311_v8  ;;  %v314_v11 = vadd.f32 %v514_v6, %v313_v10  ;;  %326 = vmax.xlane.f32.xlu0 %v311_v8  ;;  %v536_v12 = vpop.f32.mrb[3].mxu0 }
 0x13e   : > { %323 = vst [vmem:[%s321_s7 + $0x10] sm:$0xff] %v314_v11 }
 0x140   : > { %328 = vmax.xlane.f32.xlu0 %v314_v11 }
 0x145   : > { %v383_v53 = vld [vmem:[#allocation9] sm:$0xff] (!%p521_p6)  ;;  %v384_v54 = vld [vmem:[#allocation9 + $0x8] sm:$0xff] (!%p521_p6)  ;;  %v385_v58 = vld [vmem:[#allocation9 + $0x10] sm:$0xff] (!%p521_p6) }
 0x146   : > { %v386_v59 = vld [vmem:[#allocation9 + $0x18] sm:$0xff] (!%p521_p6) }
 0x1c9   : > { %v327_v15 = vpop.xlane.xlu0 %326 }
 0x1ca   : > { %v330_v16 = vmax.f32 %v324_v14, %v327_v15 }
 0x1cc   : > { %v334_v18 = vsub.f32 %v324_v14, %v330_v16  ;;  %367 = vst.msk [vmem:[#allocation2] sm:$0xff] %vm364_vm3, %v330_v16  ;;  %344 = vperm.xlu1 %621, %v330_v16  }
 0x1cd   : > { %v329_v19 = vpop.xlane.xlu0 %328 }
 0x1ce   : > { %v331_v20 = vmax.f32 %v325_v17, %v329_v19  ;;  %v336_v30 = vmul.f32 1.442695, %v334_v18 }
 0x1d0   : > { %v335_v21 = vsub.f32 %v325_v17, %v331_v20  ;;  %368 = vst.msk [vmem:[#allocation2 + $0x8] sm:$0xff] %vm364_vm3, %v331_v20  ;;  %349 = vperm.xlu1 %621, %v331_v20  }
 0x1d2   : > { %v338_v31 = vmul.f32 1.442695, %v335_v21 }
 0x1d3   : > { %v373_v46 = vld [vmem:[#allocation2] sm:$0xff] (!%p521_p6) }
 0x1d7   : > { %v374_v49 = vld [vmem:[#allocation2 + $0x8] sm:$0xff] (!%p521_p6) }
 0x24b   : > { %v345_v22 = vpop.permute.xlu1 %344 }
 0x24c   : > { %v352_v23 = vsub.f32 %v311_v8, %v345_v22 }
 0x24e   : > { %v354_v24 = vmul.f32 1.442695, %v352_v23 }
 0x24f   : > { %v350_v25 = vpop.permute.xlu1 %349 }
 0x250   : > { %626 = vpow2.f32 %v354_v24  ;;  %v353_v26 = vsub.f32 %v314_v11, %v350_v25 }
 0x252   : > { %v356_v27 = vmul.f32 1.442695, %v353_v26 }
 0x254   : > { %628 = vpow2.f32 %v356_v27 }
 0x255   : > { %630 = vpow2.f32 %v336_v30 }
 0x256   : > { %632 = vpow2.f32 %v338_v31 }
 0x25a   : > { %v627_v28 = vpop.eup %626 }
 0x25b   : > { %358 = vadd.xlane.f32.xlu0 %v627_v28 }
 0x25e   : > { %v629_v29 = vpop.eup %628 }
 0x25f   : > { %360 = vadd.xlane.f32.xlu1 %v629_v29  ;;  %v631_v32 = vpop.eup %630 }
 0x260   : > { %v340_v34 = vmul.f32 %v631_v32, %v332_v33  ;;  %v633_v35 = vpop.eup %632 }
 0x261   : > { %v341_v39 = vmul.f32 %v633_v35, %v333_v37 }
 0x2e8   : > { %v359_v36 = vpop.xlane.xlu0 %358 }
 0x2e9   : > { %v362_v38 = vadd.f32 %v359_v36, %v340_v34  ;;  %372 = sbr.rel (%p521_p6) target bundleno = 905 (0x389), region = 48 }
 0x2eb   : > { %365 = vst.msk [vmem:[#allocation3] sm:$0xff] %vm364_vm3, %v362_v38 }
 0x2ec   : > { %v361_v40 = vpop.xlane.xlu1 %360 }
 0x2ed   : > { %v363_v41 = vadd.f32 %v361_v40, %v341_v39 }
 0x2ef   : > { %366 = vst.msk [vmem:[#allocation3 + $0x8] sm:$0xff] %vm364_vm3, %v363_v41 }
 0x2f2   : > { %v375_v42 = vld [vmem:[#allocation3] sm:$0xff] }
 0x2f3   : > { %635 = vlog2.f32 %v375_v42 }
 0x2f6   : > { %v376_v44 = vld [vmem:[#allocation3 + $0x8] sm:$0xff] }
 0x2f7   : > { %637 = vlog2.f32 %v376_v44 }
 0x2fd   : > { %v636_v45 = vpop.eup %635 }
 0x2fe   : > { %v378_v48 = vmul.f32 0.6931472, %v636_v45 }
 0x300   : > { %v381_v51 = vadd.f32 %v378_v48, %v373_v46 }
 0x301   : > { %v638_v47 = vpop.eup %637 }
 0x302   : > { %v380_v50 = vmul.f32 0.6931472, %v638_v47  ;;  %389 = vperm.xlu0 %634, %v381_v51  }
 0x304   : > { %v382_v52 = vadd.f32 %v380_v50, %v374_v49 }
 0x306   : > { %394 = vperm.xlu0 %634, %v382_v52  }
 0x381   : > { %v390_v55 = vpop.permute.xlu0 %389 }
 0x382   : > { %v397_v56 = vsub.f32 %v383_v53, %v390_v55  ;;  %v398_v57 = vsub.f32 %v384_v54, %v390_v55 }
 0x384   : > { %401 = vst [vmem:[#allocation9] sm:$0xff] %v397_v56  ;;  %402 = vst [vmem:[#allocation9 + $0x8] sm:$0xff] %v398_v57 }
 0x385   : > { %v395_v60 = vpop.permute.xlu0 %394 }
 0x386   : > { %v399_v61 = vsub.f32 %v385_v58, %v395_v60  ;;  %v400_v62 = vsub.f32 %v386_v59, %v395_v60 }
 0x388   : > { %403 = vst [vmem:[#allocation9 + $0x10] sm:$0xff] %v399_v61  ;;  %404 = vst [vmem:[#allocation9 + $0x18] sm:$0xff] %v400_v62 }
 0x389 PF: > { %p975_p9 = scmp.eq.s32.totalorder %s504_s18, 1  ;;  %s794_s29 = smov [#allocation9]  }
 0x38a   : > { %s415_s30 = sshll.u32 %s794_s29, 4  ;;  %s416_s30 = int_to_ptr.vmem [resolvable:$true] %s415_s30 }
 0x38b   : > { %s697_s25 = scalar_lea.vmem %s416_s30, 512  ;;  %p704_p8 = scmp.lt.s32.totalorder %s416_s30, %s416_s30 }
 0x38c   : > { %p698_p11 = scmp.ne.s32.totalorder %s416_s30, %s697_s25  ;;  %p705_p13 = scmp.lt.s32.totalorder %s697_s25, %s697_s25 }
 0x38e   : > { %p699_p3 = pnand %p698_p11, %p975_p9  ;;  %p706_p1 = por %p705_p13, %p704_p8 }
 0x390   : > { %p700_p7 = pneg %p699_p3 }
 0x392   : > { %p707_p2 = pnand %p706_p1, %p700_p7 }
 0x394   : > { %710 = shalt.err (!%p707_p2)
}
 0x395   : > { %s711_s18 = scalar_lea.hbm %s1022_s3, 512 }
 0x396   : > { %p712_p12 = scmp.ne.s32.totalorder %s1022_s3, %s711_s18  ;;  %p717_p10 = scmp.lt.u32.totalorder %s711_s18, %s1022_s3 }
 0x398   : > { %p713_p0 = pnand %p712_p12, %p975_p9 }
 0x39a   : > { %p714_p4 = pneg %p713_p0 }
 0x39c   : > { %p719_p5 = pnand %p717_p10, %p714_p4 }
 0x39e   : > { %722 = shalt.err (!%p719_p5)
}
 0x39f   : > { %s795_s26 = smov 256   ;;  %s796_s27 = smov 16  }
 0x3a0   : > { %544 = dma.vmem_to_hbm [thread:$0]  (%p975_p9), %s416_s30, 512, %s1022_s3, [#allocation6], %s795_s26, %s795_s26, %s796_s27  }
 0x3a1   : > { %756 = dma.done.wait (%p975_p9), [#allocation6], 512  }
 0x3a2   : > { %758 = vsyncadd (%p975_p9), [#allocation6], 4294966784 }
 0x3a3 PF: > { %s18_s17 = sadd.s32 1, %s781_s17   ;;  %s1038_s9 = smov %s1045_s12 }
 0x3a4   : > { %p15_p6 = scmp.ge.s32.totalorder %s18_s17, 4   ;;  %s1039_s12 = smov %s765_s13 }
 0x3a5   : > { %s1040_s13 = smov %s769_s14  ;;  %s1041_s14 = smov %s918_s6 }
 0x3a6   : > { %s1042_s15 = smov %s777_s16  ;;  %s1043_s16 = smov %s1038_s9 }
 0x3a7   :  { %17 = sbr.rel (!%p15_p6) target bundleno = 6 (0x6), region = 88 }
 0x3ae   :  { %431 = vsyncpa [#allocation5], 1 }
 0x3af   :  { %433 = vsyncpa [#allocation5 + $0x1], 1 }
 0x3b0   :  { %434 = vsyncpa [#allocation8], 1 }
 0x3b1   :  { %436 = vsyncpa [#allocation8 + $0x1], 1 }
 0x3b2   :  { %437 = vsyncpa [#allocation6], 1 }
 0x3b3   :  { %439 = vsyncpa [#allocation6 + $0x1], 1 }

</bundles_post_ra>
